<compile_context>
chip_gen: v6e
topology: v6e:2x2x1
jax: 0.10.0
libtpu: 0.0.40
codegen_flags: <defaults>
</compile_context>

<pallas_src>
import functools

import jax
import jax.numpy as jnp
from jax.experimental import pallas as pl
from jax.experimental.pallas import tpu as pltpu


def _distill_kl_kernel(ys_ref, yt_ref, out_ref, *, inv_T: float, batch: int,
                       tile_b: int, mask_rows: bool):
    # Up-cast in-register; inputs may be bf16 in HBM.
    ys = ys_ref[...].astype(jnp.float32) * jnp.float32(inv_T)
    yt = yt_ref[...].astype(jnp.float32) * jnp.float32(inv_T)

    # Student: only the stable log-sum-exp is needed (log_softmax never built).
    ms = jnp.max(ys, axis=1, keepdims=True)
    zs = ys - ms
    lse_s = jnp.log(jnp.sum(jnp.exp(zs), axis=1, keepdims=True))

    # Teacher: unnormalized exp + its normalizer.
    mt = jnp.max(yt, axis=1, keepdims=True)
    zt = yt - mt
    et = jnp.exp(zt)
    st = jnp.sum(et, axis=1, keepdims=True)

    # sum_c p_t * (log_p_t - log_p_s)
    #   = (sum_c et*(zt - zs)) / st + lse_s - log(st)
    num = jnp.sum(et * (zt - zs), axis=1, keepdims=True)
    row_kl = num / st + lse_s - jnp.log(st)

    if mask_rows:
        # Ragged last tile: rows >= batch hold undefined data; zero them so the
        # (masked) write-back never carries garbage into the final sum.
        row0 = pl.program_id(0) * tile_b
        rows = row0 + jax.lax.broadcasted_iota(jnp.int32, (tile_b, 1), 0)
        row_kl = jnp.where(rows < batch, row_kl, jnp.float32(0.0))

    out_ref[...] = row_kl  # (tile_b, 1) per-row partial KL


def _pick_tile(B: int, C: int, in_itemsize: int) -> int:
    """Batch tile sized against the true per-step VMEM working set."""
    try:
        vmem_cap = pltpu.get_tpu_info().vmem_capacity_bytes
    except Exception:
        vmem_cap = 64 * 1024 * 1024  # conservative fallback (v7x per-TC VMEM)
    # Keep the per-step working set under ~75% of physical VMEM:
    # ~48 MiB on v7x (64 MiB/TC), ~96 MiB on v5e/v6e (128 MiB).
    budget = (vmem_cap * 3) // 4

    bytes_per_row = (2 * 2 * C * in_itemsize   # 2 inputs x double buffer
                     + 5 * C * 4)              # ~5 full-tile f32 temporaries
    max_rows = max(8, min(2048, (budget // bytes_per_row) // 8 * 8))

    # Guarantee >= 2 grid steps when possible so dimension_semantics=("parallel",)
    # actually spans both TensorCores on v7x (harmless on single-TC v5e/v6e).
    if B >= 16:
        half = ((-(-B // 2)) + 7) // 8 * 8
        max_rows = min(max_rows, max(8, half))

    if B <= max_rows:
        return B  # single full-extent tile (exempt from the 8-row rule)

    num_tiles = -(-B // max_rows)
    tile_b = ((-(-B // num_tiles)) + 7) // 8 * 8
    return tile_b


def _vmem_limit_bytes(tile_b: int, C: int, in_itemsize: int) -> int:
    work = (2 * 2 * tile_b * C * in_itemsize   # double-buffered inputs
            + 5 * tile_b * C * 4               # f32 compute temporaries
            + 2 * tile_b * 4)                  # double-buffered (tile_b, 1) out
    return int(max(work + (4 << 20), 16 << 20))


def distill_kl(y_s: jax.Array, y_t: jax.Array, T: float) -> jax.Array:
    """Pallas TPU implementation of DistillKL.forward. Returns a scalar.

    Keep logits in bf16 in HBM if they already are — the kernel up-casts
    in-register; adding a wrapper-side cast would cost an extra HBM pass.
    """
    assert y_s.shape == y_t.shape and y_s.ndim == 2
    B, C = y_s.shape
    in_itemsize = max(jnp.dtype(y_s.dtype).itemsize, jnp.dtype(y_t.dtype).itemsize)

    tile_b = _pick_tile(B, C, in_itemsize)
    grid = (pl.cdiv(B, tile_b),)
    mask_rows = (B % tile_b) != 0

    # TODO(synk): for vocab-scale C where a single (8, C) row block exceeds the
    # VMEM budget, add a C-tiled streaming log-sum-exp variant.

    kernel = functools.partial(
        _distill_kl_kernel,
        inv_T=1.0 / float(T), batch=B, tile_b=tile_b, mask_rows=mask_rows)

    row_kl = pl.pallas_call(
        kernel,
        out_shape=jax.ShapeDtypeStruct((B, 1), jnp.float32),
        grid_spec=pltpu.PrefetchScalarGridSpec(
            num_scalar_prefetch=0,
            grid=grid,
            in_specs=[
                pl.BlockSpec((tile_b, C), lambda i: (i, 0)),
                pl.BlockSpec((tile_b, C), lambda i: (i, 0)),
            ],
            out_specs=pl.BlockSpec((tile_b, 1), lambda i: (i, 0)),
        ),
        compiler_params=pltpu.CompilerParams(
            # Each grid step writes an independent output block → safe to shard
            # across TensorCores (helps on v7x, neutral on v5e/v6e).
            dimension_semantics=("parallel",),
            vmem_limit_bytes=_vmem_limit_bytes(tile_b, C, in_itemsize),
        ),
    )(y_s, y_t)

    # Tiny final reduce + hoisted T^2 / B scaling, once, outside the kernel.
    return jnp.sum(row_kl) * jnp.float32(T * T) / jnp.float32(B)


def _distill_kl_ref(y_s, y_t, T):
    """Pure-JAX reference matching the PyTorch module."""
    p_s = jax.nn.log_softmax(y_s.astype(jnp.float32) / T, axis=1)
    log_p_t = jax.nn.log_softmax(y_t.astype(jnp.float32) / T, axis=1)
    p_t = jnp.exp(log_p_t)
    return jnp.sum(p_t * (log_p_t - p_s)) * (T ** 2) / y_s.shape[0]


if __name__ == "__main__":
    T = 4.0
    B, C = 8, 32  # small batch of logits over 32 classes

    key = jax.random.PRNGKey(0)
    k_s, k_t = jax.random.split(key)
    y_s = jax.random.normal(k_s, (B, C), dtype=jnp.float32)
    y_t = jax.random.normal(k_t, (B, C), dtype=jnp.float32)

    loss = distill_kl(y_s, y_t, T)
    loss = jax.block_until_ready(loss)

    ref = _distill_kl_ref(y_s, y_t, T)
    assert jnp.allclose(loss, ref, rtol=1e-5, atol=1e-5), (loss, ref)

    print("KERNEL_OK")
</pallas_src>

<mosaic_0001>
module attributes {stable_mosaic.version = 11 : i64} {
  func.func @_distill_kl_kernel(%arg0: i32, %arg1: memref<8x32xf32, #tpu.memory_space<vmem>>, %arg2: memref<8x32xf32, #tpu.memory_space<vmem>>, %arg3: memref<8x1xf32, #tpu.memory_space<vmem>>) attributes {dimension_semantics = [#tpu.dimension_semantics<parallel>], iteration_bounds = array<i64: 1>, scalar_prefetch = 0 : i64, scratch_operands = 0 : i64, tpu.core_type = #tpu.core_type<tc>, window_params = [{transform_indices = @transform_0, window_bounds = array<i64: 8, 32>}, {transform_indices = @transform_1, window_bounds = array<i64: 8, 32>}, {transform_indices = @transform_2, window_bounds = array<i64: 8, 1>}]} {
    %c0 = arith.constant 0 : index
    %c0_0 = arith.constant 0 : index
    %0 = vector.load %arg1[%c0, %c0_0] : memref<8x32xf32, #tpu.memory_space<vmem>>, vector<8x32xf32>
    %cst = arith.constant 2.500000e-01 : f32
    %1 = vector.broadcast %cst : f32 to vector<8x32xf32>
    %2 = arith.mulf %0, %1 : vector<8x32xf32>
    %c0_1 = arith.constant 0 : index
    %c0_2 = arith.constant 0 : index
    %3 = vector.load %arg2[%c0_1, %c0_2] : memref<8x32xf32, #tpu.memory_space<vmem>>, vector<8x32xf32>
    %cst_3 = arith.constant 2.500000e-01 : f32
    %4 = vector.broadcast %cst_3 : f32 to vector<8x32xf32>
    %5 = arith.mulf %3, %4 : vector<8x32xf32>
    %cst_4 = arith.constant dense<0xFF800000> : vector<8xf32>
    %6 = vector.multi_reduction <maximumf>, %2, %cst_4 [1] : vector<8x32xf32> to vector<8xf32>
    %7 = vector.shape_cast %6 : vector<8xf32> to vector<8x1xf32>
    %8 = vector.broadcast %7 : vector<8x1xf32> to vector<8x32xf32>
    %9 = arith.subf %2, %8 : vector<8x32xf32>
    %10 = math.exp %9 : vector<8x32xf32>
    %cst_5 = arith.constant dense<0.000000e+00> : vector<8xf32>
    %11 = vector.multi_reduction <add>, %10, %cst_5 [1] : vector<8x32xf32> to vector<8xf32>
    %12 = vector.shape_cast %11 : vector<8xf32> to vector<8x1xf32>
    %13 = math.log %12 : vector<8x1xf32>
    %cst_6 = arith.constant dense<0xFF800000> : vector<8xf32>
    %14 = vector.multi_reduction <maximumf>, %5, %cst_6 [1] : vector<8x32xf32> to vector<8xf32>
    %15 = vector.shape_cast %14 : vector<8xf32> to vector<8x1xf32>
    %16 = vector.broadcast %15 : vector<8x1xf32> to vector<8x32xf32>
    %17 = arith.subf %5, %16 : vector<8x32xf32>
    %18 = math.exp %17 : vector<8x32xf32>
    %cst_7 = arith.constant dense<0.000000e+00> : vector<8xf32>
    %19 = vector.multi_reduction <add>, %18, %cst_7 [1] : vector<8x32xf32> to vector<8xf32>
    %20 = vector.shape_cast %19 : vector<8xf32> to vector<8x1xf32>
    %21 = arith.subf %17, %9 : vector<8x32xf32>
    %22 = arith.mulf %18, %21 : vector<8x32xf32>
    %cst_8 = arith.constant dense<0.000000e+00> : vector<8xf32>
    %23 = vector.multi_reduction <add>, %22, %cst_8 [1] : vector<8x32xf32> to vector<8xf32>
    %24 = vector.shape_cast %23 : vector<8xf32> to vector<8x1xf32>
    %25 = arith.divf %24, %20 : vector<8x1xf32>
    %26 = arith.addf %25, %13 : vector<8x1xf32>
    %27 = math.log %20 : vector<8x1xf32>
    %28 = arith.subf %26, %27 : vector<8x1xf32>
    %c0_9 = arith.constant 0 : index
    %c0_10 = arith.constant 0 : index
    %29 = vector.load %arg3[%c0_9, %c0_10] : memref<8x1xf32, #tpu.memory_space<vmem>>, vector<8x1xf32>
    tpu.vector_store %arg3[%c0_9, %c0_10], %28 {strides = array<i32>} : memref<8x1xf32, #tpu.memory_space<vmem>>, vector<8x1xf32>,
    return
  }
  func.func @transform_0(%arg0: i32) -> (i32, i32) {
    %c0_i32 = arith.constant 0 : i32
    %c0_i32_0 = arith.constant 0 : i32
    return %arg0, %c0_i32 : i32, i32
  }
  func.func @transform_1(%arg0: i32) -> (i32, i32) {
    %c0_i32 = arith.constant 0 : i32
    %c0_i32_0 = arith.constant 0 : i32
    return %arg0, %c0_i32 : i32, i32
  }
  func.func @transform_2(%arg0: i32) -> (i32, i32) {
    %c0_i32 = arith.constant 0 : i32
    %c0_i32_0 = arith.constant 0 : i32
    return %arg0, %c0_i32 : i32, i32
  }
}

</mosaic_0001>

<bundles_post_ra>
// kernel: tpu_custom_call.1
= control target key start
LH: loop header
LB: loop body
LE: loop exit
PB: predicated region body
PF: predicated region fallthrough
CT: control target
= control target key end

     0   :  { %7 = vsyncpa [#allocation3], 0  ;;  %s166_s0 = inlined_call_operand.hbm [shape: f32[8,32], index: 0, kind: input, shape index: {}]   ;;  %s167_s1 = inlined_call_operand.hbm [shape: f32[8,32], index: 1, kind: input, shape index: {}]   ;;  %s168_s2 = inlined_call_operand.vmem [shape: f32[8,1], index: 2, kind: output, shape index: {}]  }
   0x1   :  { %8 = vsyncpa [#allocation5], 0  ;;  %s135_s9 = smov [#allocation2]   ;;  %s136_s11 = smov [#allocation4]  }
   0x2   :  { %s15_s10 = sshll.u32 %s135_s9, 4  ;;  %s25_s12 = sshll.u32 %s136_s11, 4  ;;  %s16_s10 = int_to_ptr.vmem [resolvable:$true] %s15_s10  ;;  %s26_s12 = int_to_ptr.vmem [resolvable:$true] %s25_s12 }
   0x3   :  { %s99_s13 = scalar_lea.vmem %s16_s10, 128  ;;  %p104_p1 = scmp.lt.s32.totalorder %s16_s10, %s16_s10 }
   0x4   :  { %p100_p0 = scmp.ne.s32.totalorder %s16_s10, %s99_s13  ;;  %p105_p2 = scmp.lt.s32.totalorder %s99_s13, %s99_s13 }
   0x6   :  { %p106_p3 = por %p105_p2, %p104_p1 }
   0x8   :  { %p107_p4 = pnand %p106_p3, %p100_p0 }
   0xa   :  { %110 = shalt.err (!%p107_p4)
}
   0xb   :  { %18 = dma.hbm_to_vmem [thread:$0]  %s166_s0, 128, %s16_s10, [#allocation3]  }
   0xc   :  { %s119_s16 = scalar_lea.vmem %s26_s12, 128  ;;  %p124_p6 = scmp.lt.s32.totalorder %s26_s12, %s26_s12 }
   0xd   :  { %p120_p5 = scmp.ne.s32.totalorder %s26_s12, %s119_s16  ;;  %p125_p7 = scmp.lt.s32.totalorder %s119_s16, %s119_s16 }
   0xf   :  { %p126_p8 = por %p125_p7, %p124_p6 }
  0x11   :  { %p127_p9 = pnand %p126_p8, %p120_p5 }
  0x13   :  { %130 = shalt.err (!%p127_p9)
}
  0x14   :  { %28 = dma.hbm_to_vmem [thread:$0]  %s167_s1, 128, %s26_s12, [#allocation5]  }
  0x15   :  { %131 = dma.done.wait [#allocation3], 128  }
  0x16   :  { %132 = vsyncadd [#allocation3], 4294967168 }
  0x17   :  { %133 = dma.done.wait [#allocation5], 128  }
  0x18   :  { %134 = vsyncadd [#allocation5], 4294967168  ;;  %v35_v0 = vld [vmem:[#allocation2] sm:$0xff]  ;;  %vm39_vm0 = vcmask 261120   ;;  %v37_v1 = vld [vmem:[#allocation4] sm:$0xff]  ;;  %vm71_vm1 = vcmask 7168  }
  0x19   :  { %v36_v2 = vmul.f32 0.25, %v35_v0  ;;  %v38_v3 = vmul.f32 0.25, %v37_v1 }
  0x1b   :  { %v40_v4 = vsel %vm39_vm0, %v36_v2, -inf  ;;  %v51_v5 = vsel %vm39_vm0, %v38_v3, -inf }
  0x1c   :  { %41 = vmax.xlane.f32.xlu0 %v40_v4 }
  0x20   :  { %52 = vmax.xlane.f32.xlu0 %v51_v5 }
  0xa5   :  { %v42_v6 = vpop.xlane.xlu0 %41 }
  0xa6   :  { %v43_v7 = vsub.f32 %v36_v2, %v42_v6 }
  0xa8   :  { %v44_v8 = vmul.f32 1.442695, %v43_v7 }
  0xa9   :  { %v53_v9 = vpop.xlane.xlu0 %52 }
  0xaa   :  { %81 = vpow2.f32 %v44_v8  ;;  %v54_v10 = vsub.f32 %v38_v3, %v53_v9 }
  0xac   :  { %v55_v11 = vmul.f32 1.442695, %v54_v10  ;;  %v60_v14 = vsub.f32 %v54_v10, %v43_v7 }
  0xae   :  { %83 = vpow2.f32 %v55_v11 }
  0xb7   :  { %v82_v12 = vpop.eup %81 }
  0xb8   :  { %v46_v13 = vsel %vm39_vm0, %v82_v12, 0.0 }
  0xb9   :  { %47 = vadd.xlane.f32.xlu1 %v46_v13 }
  0xbb   :  { %v84_v15 = vpop.eup %83 }
  0xbc   :  { %v57_v16 = vsel %vm39_vm0, %v84_v15, 0.0  ;;  %v61_v17 = vmul.f32 %v84_v15, %v60_v14 }
  0xbd   :  { %58 = vadd.xlane.f32.xlu1 %v57_v16 }
  0xbe   :  { %v62_v18 = vsel %vm39_vm0, %v61_v17, 0.0 }
  0xbf   :  { %63 = vadd.xlane.f32.xlu0 %v62_v18 }
 0x142   :  { %v48_v19 = vpop.xlane.xlu1 %47 }
 0x143   :  { %85 = vlog2.f32 %v48_v19 }
 0x146   :  { %v59_v20 = vpop.xlane.xlu1 %58 }
 0x147   :  { %87 = vrcp.f32 %v59_v20 }
 0x148   :  { %89 = vlog2.f32 %v59_v20  ;;  %v64_v23 = vpop.xlane.xlu0 %63 }
 0x150   :  { %v86_v21 = vpop.eup %85 }
 0x151   :  { %v50_v25 = vmul.f32 0.6931472, %v86_v21 }
 0x154   :  { %v88_v22 = vpop.eup %87 }
 0x155   :  { %v90_v24 = vpop.eup %89  ;;  %v66_v26 = vmul.f32 %v88_v22, %v64_v23 }
 0x156   :  { %v69_v27 = vmul.f32 0.6931472, %v90_v24 }
 0x157   :  { %v67_v28 = vadd.f32 %v66_v26, %v50_v25 }
 0x159   :  { %v70_v29 = vsub.f32 %v67_v28, %v69_v27 }
 0x15b   :  { %72 = vst.msk [vmem:[%s168_s2] sm:$0xff] %vm71_vm1, %v70_v29 }
 0x15c   :  { %77 = vsyncpa [#allocation3], 1 }
 0x15d   :  { %78 = vsyncpa [#allocation5], 1 }

</bundles_post_ra>
